<compile_context>
chip_gen: v5e
topology: v5e:2x2
jax: 0.10.0
libtpu: 0.0.40
codegen_flags: <defaults>
</compile_context>

<pallas_src>
import functools

import jax
import jax.numpy as jnp
from jax import lax
from jax.experimental import pallas as pl
from jax.experimental.pallas import tpu as pltpu

_MIB = 1024 * 1024


def _layer_norm_kernel(x_ref, w_ref, b_ref, o_ref, *, eps, chunk_rows,
                       use_mxu_mean, affine_lowp):
    """LayerNorm of a (tm, D) row block, processed in chunk_rows sub-tiles."""
    tm, d = x_ref.shape
    inv_d = 1.0 / d
    out_dtype = o_ref.dtype

    # Hoist (broadcasted) affine params out of the loop — JAX does not CSE
    # broadcast_in_dim across iterations.
    if affine_lowp:
        w_row = w_ref[...].astype(out_dtype)
        b_row = b_ref[...].astype(out_dtype)
    else:
        w_row = w_ref[...]
        b_row = b_ref[...]
    w_b = jnp.broadcast_to(w_row, (chunk_rows, d))
    b_b = jnp.broadcast_to(b_row, (chunk_rows, d))

    if use_mxu_mean:
        # All-ones RHS: row sums run on the otherwise-idle MXU with f32
        # accumulation (exact for bf16 inputs). Hoisted out of the loop.
        ones_col = jnp.ones((d, 128), x_ref.dtype)

    n_chunks = tm // chunk_rows

    def body(c, carry):
        r = pl.multiple_of(c * chunk_rows, chunk_rows)
        x_nat = x_ref[pl.ds(r, chunk_rows), :]
        x = x_nat.astype(jnp.float32)

        # Pass 1: mean.
        if use_mxu_mean:
            s1 = jnp.dot(x_nat, ones_col,
                         preferred_element_type=jnp.float32)[:, :1]
        else:
            s1 = jnp.sum(x, axis=-1, keepdims=True)
        mean = s1 * inv_d

        # Pass 2: shifted variance (numerically stable; var >= 0 by
        # construction, no clamp needed).
        xc = x - mean
        var = jnp.sum(xc * xc, axis=-1, keepdims=True) * inv_d
        inv = lax.rsqrt(var + eps)

        if affine_lowp:
            # Normalize in f32; affine at packed low-precision VALU rate.
            y = (xc * inv).astype(out_dtype) * w_b + b_b
        else:
            y = ((xc * inv) * w_b + b_b).astype(out_dtype)
        o_ref[pl.ds(r, chunk_rows), :] = y
        return carry

    lax.fori_loop(0, n_chunks, body, 0)


def _tpu_generation_and_vmem():
    """(device-kind string, physical VMEM bytes) with generation-aware fallback."""
    kind = ""
    try:
        kind = jax.devices()[0].device_kind.lower()
    except Exception:
        pass
    cap = None
    try:
        cap = int(pltpu.get_tpu_info().vmem_capacity_bytes)
    except Exception:
        cap = None
    if not cap or cap <= 0:
        if "v7" in kind:
            cap = 64 * _MIB
        elif ("v5" in kind) or ("v6" in kind):
            cap = 128 * _MIB
        else:
            cap = 64 * _MIB  # unknown: assume the smallest (v7x-like)
    return kind, cap


def _round_up(v, m):
    return ((v + m - 1) // m) * m


def optimized_layer_norm(x, weight=None, bias=None, eps=1e-5, *, row_tile=None):
    """LayerNorm over the last dim, matching F.layer_norm(x, (D,), w, b, eps)."""
    orig_shape = x.shape
    D = orig_shape[-1]
    x2 = x.reshape(-1, D)
    N = x2.shape[0]

    if weight is None:
        weight = jnp.ones((D,), jnp.float32)
    if bias is None:
        bias = jnp.zeros((D,), jnp.float32)
    # Cast params to f32 once here; kernel consumes (1, D) f32 blocks.
    w2 = weight.astype(jnp.float32).reshape(1, D)
    b2 = bias.astype(jnp.float32).reshape(1, D)

    in_bytes = jnp.dtype(x.dtype).itemsize
    out_bytes = in_bytes
    is_bf16 = jnp.dtype(x.dtype) == jnp.dtype(jnp.bfloat16)

    kind, vmem_cap = _tpu_generation_and_vmem()
    is_v7 = "v7" in kind
    # v7x: 2 TCs -> ~4 grid steps lets ("parallel",) shard + double-buffer.
    # v5e/v6e: single TC, ~3 steps is plenty for the pipeline.
    steps_min = 4 if (is_v7 or not kind) else 3

    # In-kernel sub-tile: keep f32 temporaries around ~8K elements (vregs).
    chunk_rows = max(8, min(64, ((8192 // max(D, 1)) // 8) * 8))

    use_mxu_mean = is_bf16 and (D % 128 == 0)
    affine_lowp = is_bf16

    # 3-deep input pipeline only where VMEM has headroom (v5e/v6e) and the
    # per-step compute is short; final decision needs the grid step count.
    want_deep_pipe = (vmem_cap >= 96 * _MIB) and (D <= 1024)
    n_in_buf = 3 if want_deep_pipe else 2

    # VMEM working set: pipelined in/out blocks scale with tm; kernel
    # temporaries, params and the ones-matrix are fixed per grid step.
    per_row = (n_in_buf * in_bytes + 2 * out_bytes) * D
    fixed = (6 * chunk_rows * D * 4 + 4 * D * 4
             + (D * 128 * in_bytes if use_mxu_mean else 0) + 2 * _MIB)
    budget = vmem_cap // 2

    if row_tile is None:
        tm = max(chunk_rows, (budget - fixed) // max(per_row, 1))
        tm = min(tm, 2048)
        tm = min(tm, _round_up(pl.cdiv(N, steps_min), 8))
        tm = min(tm, _round_up(N, 8))
    else:
        tm = max(8, int(row_tile))
    tm = max(8, (tm // 8) * 8)
    # tm must be a multiple of the in-kernel chunk size.
    chunk_rows = min(chunk_rows, tm)
    tm = max(chunk_rows, (tm // chunk_rows) * chunk_rows)

    # No host-side padding: ragged last block is masked by Pallas
    # (rows are independent, padded reads are harmless).
    grid_steps = int(pl.cdiv(N, tm))
    grid = (grid_steps,)

    use_deep_pipe = want_deep_pipe and grid_steps >= 3 and hasattr(pl, "Buffered")

    est = tm * per_row + fixed
    vmem_limit = int(min(vmem_cap * 3 // 4, max(est * 5 // 4, 32 * _MIB)))

    x_spec = pl.BlockSpec((tm, D), lambda i: (i, 0))
    if use_deep_pipe:
        try:
            x_spec = pl.BlockSpec((tm, D), lambda i: (i, 0),
                                  pipeline_mode=pl.Buffered(3))
        except TypeError:
            pass  # older BlockSpec signature: fall back to default 2-deep

    kernel = functools.partial(
        _layer_norm_kernel, eps=float(eps), chunk_rows=int(chunk_rows),
        use_mxu_mean=use_mxu_mean, affine_lowp=affine_lowp)

    # LayerNorm is HBM-bound: tell XLA its true byte cost.
    cost = pl.CostEstimate(
        flops=int(10 * N * D),
        transcendentals=int(N),
        bytes_accessed=int((in_bytes + out_bytes) * N * D + 8 * D),
    )

    out = pl.pallas_call(
        kernel,
        out_shape=jax.ShapeDtypeStruct((N, D), x.dtype),
        grid_spec=pltpu.PrefetchScalarGridSpec(
            num_scalar_prefetch=0,
            grid=grid,
            in_specs=[
                x_spec,
                pl.BlockSpec((1, D), lambda i: (0, 0)),
                pl.BlockSpec((1, D), lambda i: (0, 0)),
            ],
            out_specs=pl.BlockSpec((tm, D), lambda i: (i, 0)),
        ),
        compiler_params=pltpu.CompilerParams(
            dimension_semantics=("parallel",),
            vmem_limit_bytes=vmem_limit,
        ),
        cost_estimate=cost,
    )(x2, w2, b2)

    return out.reshape(orig_shape)


def reference_layer_norm(x, weight, bias, eps=1e-5):
    x32 = x.astype(jnp.float32)
    mean = jnp.mean(x32, axis=-1, keepdims=True)
    var = jnp.mean((x32 - mean) ** 2, axis=-1, keepdims=True)
    y = (x32 - mean) * lax.rsqrt(var + eps)
    return (y * weight.astype(jnp.float32) + bias.astype(jnp.float32)).astype(x.dtype)


if __name__ == "__main__":
    key = jax.random.PRNGKey(0)
    batch, seq, hidden = 2, 8, 256   # hidden is a lane-width (128) multiple
    eps = 1e-5

    kx, kw, kb, kx2 = jax.random.split(key, 4)
    x = jax.random.normal(kx, (batch, seq, hidden), dtype=jnp.float32)
    weight = jnp.ones((hidden,), jnp.float32) + 0.1 * jax.random.normal(
        kw, (hidden,), dtype=jnp.float32)
    bias = 0.1 * jax.random.normal(kb, (hidden,), dtype=jnp.float32)

    # 1) f32, zero-mean rows.
    out = jax.block_until_ready(optimized_layer_norm(x, weight, bias, eps))
    ref = reference_layer_norm(x, weight, bias, eps)
    assert out.shape == x.shape
    assert jnp.allclose(out, ref, atol=2e-5, rtol=2e-5), "f32 mismatch"

    # 2) f32, non-zero-mean rows (exercises the shifted two-pass variance).
    x_shift = x + 8.0
    out_s = jax.block_until_ready(optimized_layer_norm(x_shift, weight, bias, eps))
    ref_s = reference_layer_norm(x_shift, weight, bias, eps)
    assert jnp.allclose(out_s, ref_s, atol=5e-4, rtol=5e-4), "shifted-mean mismatch"

    # 3) Ragged row count (N = 15 rows, not a multiple of the row tile):
    #    exercises the masked last block that replaced host-side padding.
    x_ragged = jax.random.normal(kx2, (3, 5, hidden), dtype=jnp.float32)
    out_r = jax.block_until_ready(optimized_layer_norm(x_ragged, weight, bias, eps))
    ref_r = reference_layer_norm(x_ragged, weight, bias, eps)
    assert out_r.shape == x_ragged.shape
    assert jnp.allclose(out_r, ref_r, atol=2e-5, rtol=2e-5), "ragged mismatch"

    # 4) bf16 path: MXU row sums for the mean + packed-bf16 affine.
    x_bf = x.astype(jnp.bfloat16)
    out_bf = jax.block_until_ready(optimized_layer_norm(x_bf, weight, bias, eps))
    ref_bf = reference_layer_norm(x_bf, weight, bias, eps)
    assert out_bf.dtype == jnp.bfloat16 and out_bf.shape == x_bf.shape
    assert jnp.allclose(out_bf.astype(jnp.float32), ref_bf.astype(jnp.float32),
                        atol=8e-2, rtol=8e-2), "bf16 mismatch"

    print("KERNEL_OK")
</pallas_src>

<mosaic_0001>
module attributes {stable_mosaic.version = 11 : i64} {
  func.func @_layer_norm_kernel(%arg0: i32, %arg1: memref<8x256xf32, #tpu.memory_space<vmem>>, %arg2: memref<1x256xf32, #tpu.memory_space<vmem>>, %arg3: memref<1x256xf32, #tpu.memory_space<vmem>>, %arg4: memref<8x256xf32, #tpu.memory_space<vmem>>) attributes {dimension_semantics = [#tpu.dimension_semantics<parallel>], iteration_bounds = array<i64: 2>, scalar_prefetch = 0 : i64, scratch_operands = 0 : i64, tpu.core_type = #tpu.core_type<tc>, window_params = [{transform_indices = @transform_0, window_bounds = array<i64: 8, 256>}, {pipeline_mode = #tpu.pipeline_mode<synchronous>, transform_indices = @transform_1, window_bounds = array<i64: 1, 256>}, {pipeline_mode = #tpu.pipeline_mode<synchronous>, transform_indices = @transform_2, window_bounds = array<i64: 1, 256>}, {transform_indices = @transform_3, window_bounds = array<i64: 8, 256>}]} {
    %c0 = arith.constant 0 : index
    %c0_0 = arith.constant 0 : index
    %0 = vector.load %arg2[%c0, %c0_0] : memref<1x256xf32, #tpu.memory_space<vmem>>, vector<1x256xf32>
    %c0_1 = arith.constant 0 : index
    %c0_2 = arith.constant 0 : index
    %1 = vector.load %arg3[%c0_1, %c0_2] : memref<1x256xf32, #tpu.memory_space<vmem>>, vector<1x256xf32>
    %2 = vector.shape_cast %0 : vector<1x256xf32> to vector<1x256xf32>
    %3 = vector.broadcast %2 : vector<1x256xf32> to vector<8x256xf32>
    %4 = vector.shape_cast %1 : vector<1x256xf32> to vector<1x256xf32>
    %5 = vector.broadcast %4 : vector<1x256xf32> to vector<8x256xf32>
    %c0_i32 = arith.constant 0 : i32
    %c8_i32 = arith.constant 8 : i32
    %6 = arith.muli %c0_i32, %c8_i32 : i32
    %7 = tpu.assume_multiple %6, 8 : i32
    %8 = arith.index_cast %7 : i32 to index
    %c0_3 = arith.constant 0 : index
    %9 = vector.load %arg1[%8, %c0_3] : memref<8x256xf32, #tpu.memory_space<vmem>>, vector<8x256xf32>
    %cst = arith.constant dense<0.000000e+00> : vector<8xf32>
    %10 = vector.multi_reduction <add>, %9, %cst [1] : vector<8x256xf32> to vector<8xf32>
    %11 = vector.shape_cast %10 : vector<8xf32> to vector<8x1xf32>
    %cst_4 = arith.constant 3.906250e-03 : f32
    %12 = vector.broadcast %cst_4 : f32 to vector<8x1xf32>
    %13 = arith.mulf %11, %12 : vector<8x1xf32>
    %14 = vector.broadcast %13 : vector<8x1xf32> to vector<8x256xf32>
    %15 = arith.subf %9, %14 : vector<8x256xf32>
    %16 = arith.mulf %15, %15 : vector<8x256xf32>
    %cst_5 = arith.constant dense<0.000000e+00> : vector<8xf32>
    %17 = vector.multi_reduction <add>, %16, %cst_5 [1] : vector<8x256xf32> to vector<8xf32>
    %18 = vector.shape_cast %17 : vector<8xf32> to vector<8x1xf32>
    %cst_6 = arith.constant 3.906250e-03 : f32
    %19 = vector.broadcast %cst_6 : f32 to vector<8x1xf32>
    %20 = arith.mulf %18, %19 : vector<8x1xf32>
    %cst_7 = arith.constant 9.99999974E-6 : f32
    %21 = vector.broadcast %cst_7 : f32 to vector<8x1xf32>
    %22 = arith.addf %20, %21 : vector<8x1xf32>
    %23 = math.rsqrt %22 : vector<8x1xf32>
    %24 = vector.broadcast %23 : vector<8x1xf32> to vector<8x256xf32>
    %25 = arith.mulf %15, %24 : vector<8x256xf32>
    %26 = arith.mulf %25, %3 : vector<8x256xf32>
    %27 = arith.addf %26, %5 : vector<8x256xf32>
    %28 = arith.index_cast %7 : i32 to index
    %c0_8 = arith.constant 0 : index
    %29 = vector.load %arg4[%28, %c0_8] : memref<8x256xf32, #tpu.memory_space<vmem>>, vector<8x256xf32>
    tpu.vector_store %arg4[%28, %c0_8], %27 {strides = array<i32>} : memref<8x256xf32, #tpu.memory_space<vmem>>, vector<8x256xf32>,
    %c1_i32 = arith.constant 1 : i32
    return
  }
  func.func @transform_0(%arg0: i32) -> (i32, i32) {
    %c0_i32 = arith.constant 0 : i32
    %c0_i32_0 = arith.constant 0 : i32
    return %arg0, %c0_i32 : i32, i32
  }
  func.func @transform_1(%arg0: i32) -> (i32, i32) {
    %c0_i32 = arith.constant 0 : i32
    %c0_i32_0 = arith.constant 0 : i32
    %c0_i32_1 = arith.constant 0 : i32
    return %c0_i32, %c0_i32_0 : i32, i32
  }
  func.func @transform_2(%arg0: i32) -> (i32, i32) {
    %c0_i32 = arith.constant 0 : i32
    %c0_i32_0 = arith.constant 0 : i32
    %c0_i32_1 = arith.constant 0 : i32
    return %c0_i32, %c0_i32_0 : i32, i32
  }
  func.func @transform_3(%arg0: i32) -> (i32, i32) {
    %c0_i32 = arith.constant 0 : i32
    %c0_i32_0 = arith.constant 0 : i32
    return %arg0, %c0_i32 : i32, i32
  }
}

</mosaic_0001>

<bundles_post_ra>
// kernel: tpu_custom_call.1
= control target key start
LH: loop header
LB: loop body
LE: loop exit
PB: predicated region body
PF: predicated region fallthrough
CT: control target
= control target key end

     0   :  { %8 = vsyncpa [#allocation3], 0  ;;  %s792_s0 = inlined_call_operand.hbm [shape: f32[16,256], index: 0, kind: input, shape index: {}]   ;;  %s793_s1 = inlined_call_operand.hbm [shape: f32[1,256], index: 1, kind: input, shape index: {}]   ;;  %s794_s2 = inlined_call_operand.hbm [shape: f32[1,256], index: 2, kind: input, shape index: {}]   ;;  %s795_s3 = inlined_call_operand.hbm [shape: f32[16,256], index: 3, kind: output, shape index: {}]  }
   0x1   :  { %10 = vsyncpa [#allocation3 + $0x1], 0 }
   0x2   :  { %11 = vsyncpa [#allocation6], 0 }
   0x3   :  { %12 = vsyncpa [#allocation4], 0 }
   0x4   :  { %14 = vsyncpa [#allocation4 + $0x1], 0  ;;  %s647_s12 = smov 0   ;;  %s649_s13 = smov 0  }
   0x5   :  { %s651_s14 = smov 0   ;;  %s653_s15 = smov 0  }
   0x6 LB: > { %s668_s16 = sadd.s32 4294967295, %s623_s15   ;;  %s374_s17 = sadd.s32 4294967294, %s623_s15   ;;  %s623_s15 = sphi %s653_s15, %s805_s15   ;;  %s619_s14 = sphi %s651_s14, %s804_s14   ;;  %s615_s13 = sphi %s649_s13, %s803_s13   ;;  %s611_s12 = sphi %s647_s12, %s802_s12  }
   0x7   : > { %p40_p0 = scmp.ne.s32.totalorder %s615_s13, %s611_s12  ;;  %p41_p1 = scmp.eq.s32.totalorder %s668_s16, 0 }
   0x8   : > { %p106_p2 = scmp.eq.s32.totalorder %s668_s16, 1  ;;  %p112_p3 = scmp.eq.s32.totalorder %s374_s17, 1 }
   0x9   : > { %p677_p4 = por %p41_p1, %p40_p0  ;;  %p375_p5 = scmp.ge.s32.totalorder %s623_s15, 1 }
   0xa   : > { %p682_p6 = por %p112_p3, %p40_p0  ;;  %p119_p7 = scmp.lt.s32.totalorder %s623_s15, 3 }
   0xb   : > { %s131_s22 = sshll.u32 %s793_s1, 4  ;;  %s625_s24 = smov [#allocation5]   ;;  %s132_s22 = int_to_ptr.hbm [resolvable:$true] %s131_s22 }
   0xc   : > { %p690_p8 = pnand %p375_p5, %p119_p7  ;;  %s133_s25 = sshll.u32 %s625_s24, 4  ;;  %s134_s25 = int_to_ptr.vmem [resolvable:$true] %s133_s25 }
   0xd   : > { %s143_s28 = sshll.u32 %s794_s2, 4  ;;  %s626_s29 = smov [#allocation7]   ;;  %s144_s28 = int_to_ptr.hbm [resolvable:$true] %s143_s28 }
   0xe   : > { %p406_p10 = pneg %p690_p8  ;;  %s145_s30 = sshll.u32 %s626_s29, 4  ;;  %s146_s30 = int_to_ptr.vmem [resolvable:$true] %s145_s30 }
   0xf   : > { %s703_s4 = sadd.s32 1, %s623_s15   ;;  %s27_s5 = sadd.s32 1, %s619_s14 }
  0x10   : > { %p407_p11 = pnand %p406_p10, %p41_p1  ;;  %s24_s6 = ssub.s32 %s623_s15, %s703_s4 }
  0x11   : > { %p34_p12 = scmp.ne.s32.totalorder %s619_s14, %s615_s13  ;;  %p25_p13 = scmp.eq.s32.totalorder %s24_s6, 0 }
  0x12   : > { %409 = dma.hbm_to_vmem [thread:$0]  (!%p407_p11), %s132_s22, 32, %s134_s25, [#allocation6]  }
  0x13   : > { %412 = dma.hbm_to_vmem [thread:$0]  (!%p407_p11), %s144_s28, 32, %s146_s30, [#allocation6]  }
  0x14   : > { %p35_p0 = scmp.eq.s32.totalorder %s623_s15, 0  ;;  %p713_p3 = por %p106_p2, %p34_p12 }
  0x15   : > { %p423_p5 = scmp.lt.s32.totalorder %s623_s15, 2  ;;  %s156_s9 = sand.u32 1, %s619_s14  }
  0x16   : > { %s719_s8 = scalar_select %p25_p13, %s619_s14, %s27_s5  }
  0x17   : > { %p36_p7 = por %p35_p0, %p34_p12  ;;  %s379_s10 = sshll.u32 %s156_s9, 4 }
  0x18   : > { %s392_s11 = sshll.u32 %s623_s15, 4  ;;  %s160_s22 = scalar_lea.vmem [#allocation2], %s379_s10 }
  0x19   : > { %s165_s21 = scalar_lea.hbm %s792_s0, %s392_s11  ;;  %s169_s24 = sshll.u32 %s160_s22, 4  ;;  %s170_s24 = int_to_ptr.vmem [resolvable:$true] %s169_s24 }
  0x1a   : > { %s167_s25 = sshll.u32 %s165_s21, 4  ;;  %p726_p2 = pnand %p423_p5, %p36_p7  ;;  %s168_s25 = int_to_ptr.hbm [resolvable:$true] %s167_s25 }
  0x1b   : > { %s157_s27 = scalar_lea.sflag [#allocation3], %s156_s9  ;;  %s523_s28 = sshra.s32 %s168_s25, 4  ;;  %s524_s28 = int_to_ptr.hbm [resolvable:$true] %s523_s28 }
  0x1c   : > { %s525_s29 = scalar_lea.hbm %s524_s28, 16  ;;  %p527_p11 = pneg %p726_p2 }
  0x1d   : > { %p526_p10 = scmp.ne.s32.totalorder %s524_s28, %s525_s29  ;;  %s530_s6 = scalar_lea.hbm %s792_s0, 32 }
  0x1e   : > { %p531_p0 = scmp.lt.s32.totalorder %s524_s28, %s792_s0  ;;  %p532_p5 = scmp.lt.s32.totalorder %s530_s6, %s525_s29 }
  0x1f   : > { %p528_p12 = pnand %p527_p11, %p526_p10 }
  0x20   : > { %p533_p7 = por %p532_p5, %p531_p0 }
  0x21   : > { %p529_p13 = pneg %p528_p12 }
  0x23   : > { %p534_p9 = pnand %p533_p7, %p529_p13 }
  0x25   : > { %537 = shalt.err (!%p534_p9)
}
  0x26   : > { %416 = dma.hbm_to_vmem [thread:$0]  (!%p726_p2), %s168_s25, 256, %s170_s24, %s157_s27  }
  0x27   : > { %178 = sbr.rel (%p690_p8) target bundleno = 322 (0x142), region = 32  ;;  %s743_s9 = sand.u32 (!%p690_p8), 1, %s615_s13  }
  0x28   : > { %s383_s17 = sshll.u32 (!%p690_p8), %s743_s9, 4  ;;  %s181_s20 = scalar_lea.sflag (!%p690_p8), [#allocation3], %s743_s9 }
  0x29   : > { %s184_s21 = scalar_lea.vmem (!%p690_p8), [#allocation2], %s383_s17 }
  0x2c   : > { %598 = dma.done.wait (%p677_p4), %s181_s20, 256  }
  0x2d   : > { %600 = vsyncadd (%p677_p4), %s181_s20, 4294967040 }
  0x2e   : > { %602 = dma.done.wait (%p41_p1), [#allocation6], 64  }
  0x2f   : > { %604 = vsyncadd (%p41_p1), [#allocation6], 4294967232  ;;  %v233_v0 = vld [vmem:[%s184_s21] sm:$0xff]  ;;  %v234_v1 = vld [vmem:[%s184_s21 + $0x8] sm:$0xff]  ;;  %s393_s18 = sshll.u32 %s668_s16, 4  ;;  %s217_s16 = scalar_lea.vmem [#allocation8], %s383_s17 }
  0x30   : > { %v235_v2 = vadd.f32 %v234_v1, %v233_v0  ;;  %v218_v17 = vld [vmem:[#allocation5] sm:$0x3]  ;;  %v219_v20 = vld [vmem:[#allocation7] sm:$0x3]  ;;  %s280_s24 = scalar_lea.hbm %s795_s3, %s393_s18  ;;  %s282_s25 = sshll.u32 %s217_s16, 4  ;;  %s283_s25 = int_to_ptr.vmem [resolvable:$true] %s282_s25 }
  0x31   : > { %v221_v21 = vperm.slane %v218_v17, 0  ;;  %v222_v22 = vperm.slane %v218_v17, 1  ;;  %v226_v26 = vperm.slane %v219_v20, 0  ;;  %v227_v27 = vperm.slane %v219_v20, 1  ;;  %s284_s26 = sshll.u32 %s280_s24, 4  ;;  %s269_s27 = scalar_lea.sflag [#allocation4], %s743_s9  ;;  %s285_s26 = int_to_ptr.hbm [resolvable:$true] %s284_s26 }
  0x32   : > { %236 = vadd.xlane.f32.xlu0 %v235_v2  ;;  %s567_s28 = sshra.s32 %s285_s26, 4  ;;  %s573_s6 = scalar_lea.hbm %s795_s3, 32  ;;  %s568_s28 = int_to_ptr.hbm [resolvable:$true] %s567_s28 }
  0x33   : > { %s569_s29 = scalar_lea.hbm %s568_s28, 16  ;;  %p574_p9 = scmp.lt.s32.totalorder %s568_s28, %s795_s3 }
  0x34   : > { %p570_p1 = scmp.ne.s32.totalorder %s568_s28, %s569_s29  ;;  %p575_p2 = scmp.lt.s32.totalorder %s573_s6, %s569_s29 }
  0x36   : > { %p571_p4 = pnand %p570_p1, %p713_p3  ;;  %p576_p10 = por %p575_p2, %p574_p9 }
  0x38   : > { %p572_p8 = pneg %p571_p4 }
  0x3a   : > { %p577_p11 = pnand %p576_p10, %p572_p8 }
  0xa5   : > { %v237_v3 = vpop.xlane.xlu0 %236 }
  0xa6   : > { %v238_v4 = vmul.f32 0.00390625, %v237_v3 }
  0xa8   : > { %v239_v5 = vsub.f32 %v233_v0, %v238_v4  ;;  %v240_v6 = vsub.f32 %v234_v1, %v238_v4 }
  0xaa   : > { %v241_v7 = vmul.f32 %v239_v5, %v239_v5  ;;  %v242_v8 = vmul.f32 %v240_v6, %v240_v6 }
  0xac   : > { %v243_v9 = vadd.f32 %v242_v8, %v241_v7 }
  0xae   : > { %244 = vadd.xlane.f32.xlu0 %v243_v9 }
 0x121   : > { %v245_v10 = vpop.xlane.xlu0 %244 }
 0x122   : > { %v246_v11 = vmul.f32 0.00390625, %v245_v10 }
 0x124   : > { %v247_v12 = vadd.f32 1e-05, %v246_v11 }
 0x126   : > { %461 = vrsqrt.f32 %v247_v12  ;;  %vm254_vm1 = vweird.f32 %v247_v12 }
 0x12c   : > { %v462_v13 = vpop.eup %461 }
 0x12d   : > { %v249_v14 = vmul.f32 %v462_v13, %v247_v12  ;;  %vm255_vm0 = vweird.f32 %v462_v13 }
 0x12e   : > { %vm256_vm2 = vmor %vm254_vm1, %vm255_vm0 }
 0x12f   : > { %v250_v15 = vmul.f32 %v462_v13, %v249_v14 }
 0x131   : > { %v251_v16 = vmul.f32 0.5, %v250_v15 }
 0x133   : > { %v252_v18 = vsub.f32 1.5, %v251_v16 }
 0x135   : > { %v253_v19 = vmul.f32 %v462_v13, %v252_v18 }
 0x137   : > { %v257_v23 = vsel %vm256_vm2, %v462_v13, %v253_v19 }
 0x138   : > { %v258_v24 = vmul.f32 %v257_v23, %v239_v5  ;;  %v259_v25 = vmul.f32 %v257_v23, %v240_v6 }
 0x13a   : > { %v260_v28 = vmul.f32 %v258_v24, %v221_v21  ;;  %v261_v29 = vmul.f32 %v259_v25, %v222_v22 }
 0x13c   : > { %v262_v30 = vadd.f32 %v260_v28, %v226_v26  ;;  %v263_v31 = vadd.f32 %v261_v29, %v227_v27 }
 0x13e   : > { %266 = vst [vmem:[%s217_s16] sm:$0xff] %v262_v30 }
 0x13f   : > { %267 = vst [vmem:[%s217_s16 + $0x8] sm:$0xff] %v263_v31 }
 0x140   : > { %580 = shalt.err (!%p577_p11)
}
 0x141   : > { %404 = dma.vmem_to_hbm [thread:$0]  (%p713_p3), %s283_s25, 256, %s285_s26, %s269_s27  }
 0x142 PF: > { %s296_s9 = sand.u32 1, %s611_s12   ;;  %p801_p12 = scmp.ge.s32.totalorder %s623_s15, 2 }
 0x143   : > { %s297_s17 = scalar_lea.sflag [#allocation4], %s296_s9 }
 0x144   : > { %p418_p13 = pnand %p801_p12, %p682_p6 }
 0x146   : > { %p419_p0 = pneg %p418_p13 }
 0x148   : > { %606 = dma.done.wait (%p419_p0), %s297_s17, 256  }
 0x149   : > { %608 = vsyncadd (%p419_p0), %s297_s17, 4294967040  ;;  %p17_p5 = scmp.ge.s32.totalorder %s703_s4, 4   ;;  %s802_s12 = smov %s615_s13 }
 0x14a   : > { %s803_s13 = smov %s619_s14  ;;  %s804_s14 = smov %s719_s8 }
 0x14b   : > { %s805_s15 = smov %s703_s4  ;;  %19 = sbr.rel (!%p17_p5) target bundleno = 6 (0x6), region = 87 }
 0x150   :  { %303 = vsyncpa [#allocation3], 1 }
 0x151   :  { %305 = vsyncpa [#allocation3 + $0x1], 1 }
 0x152   :  { %306 = vsyncpa [#allocation6], 1 }
 0x153   :  { %307 = vsyncpa [#allocation4], 1 }
 0x154   :  { %309 = vsyncpa [#allocation4 + $0x1], 1 }

</bundles_post_ra>
